<compile_context>
chip_gen: v7x
topology: tpu7x:2x2x1
jax: 0.10.0
libtpu: 0.0.40
codegen_flags: <defaults>
</compile_context>

<pallas_src>
import jax
import jax.numpy as jnp
from jax.experimental import pallas as pl
from jax.experimental.pallas import tpu as pltpu

LANES = 128
SUBLANES = 8
MAX_BLOCK_ROWS = 8192          # (8192, 128) f32 = 4 MiB per input block

# FocalDiceLoss hyperparameters (from the module __init__)
FOCAL_ALPHA = 0.25
FOCAL_GAMMA = 2.0              # applied as an explicit square below
DICE_SMOOTH = 1.0
MIX_ALPHA = 0.5


def _cdiv(a, b):
    return -(-a // b)


def _default_num_shards():
    # 2 TensorCores per chip on v7x; 1 on v5e/v6e.
    # TODO(synk): on v7x verify the "parallel" shard axis really maps onto both
    # TensorCores in the trace; if not, switch to pltpu.CORE_PARALLEL.
    try:
        kind = jax.devices()[0].device_kind.lower()
    except Exception:
        return 1
    return 2 if "v7" in kind else 1


def _focal_dice_kernel(x_ref, t_ref, out_ref, acc_ref):
    """Accumulates [sum((1-pt)^2*bce), sum(sig*t), sum(sig+t)] per shard."""
    i = pl.program_id(1)               # reduction step (arbitrary axis)

    @pl.when(i == 0)
    def _init():
        acc_ref[...] = jnp.zeros_like(acc_ref)

    x = x_ref[...].astype(jnp.float32)
    t = t_ref[...].astype(jnp.float32)

    # e = exp(-|x|) is reused for both the stable BCE and the sigmoid.
    e = jnp.exp(-jnp.abs(x))
    # Numerically stable binary_cross_entropy_with_logits (reduction='none'):
    #   bce = max(x, 0) - x*t + log1p(exp(-|x|))
    bce = jnp.maximum(x, 0.0) - x * t + jnp.log1p(e)
    pt = jnp.exp(-bce)                 # valid for soft targets too
    m = 1.0 - pt
    # sigmoid(x) = 1/(1+e) for x>=0, e/(1+e) for x<0 (single divide, no extra exp)
    sig = jnp.where(x >= 0.0, 1.0, e) / (1.0 + e)

    # Fold the block into one (8, 128) vreg per statistic with pure VPU adds.
    block_rows = x.shape[0]
    shape3 = (block_rows // SUBLANES, SUBLANES, LANES)
    acc_ref[0] += jnp.sum(((m * m) * bce).reshape(shape3), axis=0)   # alpha folded out
    acc_ref[1] += jnp.sum((sig * t).reshape(shape3), axis=0)
    acc_ref[2] += jnp.sum((sig + t).reshape(shape3), axis=0)

    @pl.when(i == pl.num_programs(1) - 1)
    def _finalize():
        out_ref[0] = acc_ref[...]


def _partial_sums_jnp(x, t):
    """Same three partial sums, plain jnp (used only for the tiny ragged tail)."""
    x = x.astype(jnp.float32)
    t = t.astype(jnp.float32)
    e = jnp.exp(-jnp.abs(x))
    bce = jnp.maximum(x, 0.0) - x * t + jnp.log1p(e)
    m = 1.0 - jnp.exp(-bce)
    sig = jnp.where(x >= 0.0, 1.0, e) / (1.0 + e)
    return jnp.stack([jnp.sum((m * m) * bce),
                      jnp.sum(sig * t),
                      jnp.sum(sig) + jnp.sum(t)])


def focal_dice_loss(logits, targets, *, num_shards=None,
                    max_block_rows=MAX_BLOCK_ROWS):
    """FocalDiceLoss.forward(logits, targets) -> scalar float32.

    Pass `targets` (and bf16 logits) in their native dtype; casting to f32
    happens inside the kernel, keeping the HBM streams narrow.
    """
    assert logits.shape == targets.shape
    n_elems = int(logits.size)
    assert n_elems > 0

    if num_shards is None:
        num_shards = _default_num_shards()

    x_flat = logits.reshape(-1)
    t_flat = targets.reshape(-1)

    rows_full = n_elems // LANES
    rows_per_shard = rows_full // num_shards
    if rows_per_shard < SUBLANES:          # too small to shard usefully
        num_shards = 1
        rows_per_shard = rows_full

    sums = None
    bulk = 0
    if rows_per_shard >= SUBLANES:
        steps = max(1, _cdiv(rows_per_shard, max_block_rows))
        block_rows = (rows_per_shard // steps) // SUBLANES * SUBLANES
        if block_rows >= SUBLANES:
            bulk_rows = num_shards * steps * block_rows
            bulk = bulk_rows * LANES
            x2d = x_flat[:bulk].reshape(bulk_rows, LANES)
            t2d = t_flat[:bulk].reshape(bulk_rows, LANES)

            partials = pl.pallas_call(
                _focal_dice_kernel,
                out_shape=jax.ShapeDtypeStruct(
                    (num_shards, 3, SUBLANES, LANES), jnp.float32),
                grid_spec=pltpu.PrefetchScalarGridSpec(
                    num_scalar_prefetch=0,
                    grid=(num_shards, steps),
                    in_specs=[
                        pl.BlockSpec((block_rows, LANES),
                                     lambda c, i: (c * steps + i, 0)),
                        pl.BlockSpec((block_rows, LANES),
                                     lambda c, i: (c * steps + i, 0)),
                    ],
                    out_specs=pl.BlockSpec((1, 3, SUBLANES, LANES),
                                           lambda c, i: (c, 0, 0, 0)),
                    scratch_shapes=[pltpu.VMEM((3, SUBLANES, LANES),
                                               jnp.float32)],
                ),
                compiler_params=pltpu.CompilerParams(
                    dimension_semantics=("parallel", "arbitrary"),
                    vmem_limit_bytes=32 * 1024 * 1024,
                ),
            )(x2d, t2d)
            sums = jnp.sum(partials, axis=(0, 2, 3))        # (3,)

    if bulk != n_elems:
        tail = _partial_sums_jnp(x_flat[bulk:], t_flat[bulk:])
        sums = tail if sums is None else sums + tail

    focal = FOCAL_ALPHA * sums[0] / jnp.float32(n_elems)
    dice = (2.0 * sums[1] + DICE_SMOOTH) / (sums[2] + DICE_SMOOTH)
    dice_loss = 1.0 - dice
    return MIX_ALPHA * focal + (1.0 - MIX_ALPHA) * dice_loss


def _reference(logits, targets):
    x = logits.astype(jnp.float32)
    t = targets.astype(jnp.float32)
    bce = jnp.maximum(x, 0.0) - x * t + jnp.log1p(jnp.exp(-jnp.abs(x)))
    pt = jnp.exp(-bce)
    focal = jnp.mean(FOCAL_ALPHA * (1.0 - pt) ** FOCAL_GAMMA * bce)
    sig = jax.nn.sigmoid(x)
    inter = jnp.sum(sig * t)
    dice = (2.0 * inter + DICE_SMOOTH) / (jnp.sum(sig) + jnp.sum(t) + DICE_SMOOTH)
    return MIX_ALPHA * focal + (1.0 - MIX_ALPHA) * (1.0 - dice)


if __name__ == "__main__":
    key = jax.random.PRNGKey(0)
    k1, k2 = jax.random.split(key)

    # 1) NCHW, small shapes: batch=2, channels=4, spatial=16 (block-aligned).
    logits = jax.random.normal(k1, (2, 4, 16, 16), dtype=jnp.float32)
    targets = (jax.random.uniform(k2, (2, 4, 16, 16)) > 0.5).astype(jnp.float32)
    loss = focal_dice_loss(logits, targets)
    jax.block_until_ready(loss)
    ref = _reference(logits, targets)
    assert jnp.allclose(loss, ref, atol=1e-5, rtol=1e-5), (loss, ref)

    # 2) Ragged element count: Pallas bulk + jnp tail path.
    k3, k4 = jax.random.split(k1)
    logits2 = jax.random.normal(k3, (2, 3, 33, 33), dtype=jnp.float32)
    targets2 = (jax.random.uniform(k4, (2, 3, 33, 33)) > 0.5).astype(jnp.float32)
    loss2 = focal_dice_loss(logits2, targets2)
    jax.block_until_ready(loss2)
    ref2 = _reference(logits2, targets2)
    assert jnp.allclose(loss2, ref2, atol=1e-5, rtol=1e-5), (loss2, ref2)

    # 3) Multi-step + 2-shard accumulation path (small max_block_rows override),
    #    with narrow-dtype (bf16) targets exercising the in-kernel cast.
    k5, k6 = jax.random.split(k2)
    logits3 = jax.random.normal(k5, (2, 4, 32, 32), dtype=jnp.float32)
    targets3 = (jax.random.uniform(k6, (2, 4, 32, 32)) > 0.5).astype(jnp.bfloat16)
    loss3 = focal_dice_loss(logits3, targets3, num_shards=2, max_block_rows=16)
    jax.block_until_ready(loss3)
    ref3 = _reference(logits3, targets3)
    assert jnp.allclose(loss3, ref3, atol=1e-5, rtol=1e-5), (loss3, ref3)

    # 4) Tiny input (< one 8x128 block): pure jnp fallback path.
    k7, k8 = jax.random.split(k3)
    logits4 = jax.random.normal(k7, (3, 5), dtype=jnp.float32)
    targets4 = (jax.random.uniform(k8, (3, 5)) > 0.5).astype(jnp.float32)
    loss4 = focal_dice_loss(logits4, targets4)
    jax.block_until_ready(loss4)
    ref4 = _reference(logits4, targets4)
    assert jnp.allclose(loss4, ref4, atol=1e-5, rtol=1e-5), (loss4, ref4)

    print("KERNEL_OK")
</pallas_src>

<mosaic_0001>
module attributes {stable_mosaic.version = 11 : i64} {
  func.func @_focal_dice_kernel(%arg0: i32, %arg1: i32, %arg2: memref<16x128xf32, #tpu.memory_space<vmem>>, %arg3: memref<16x128xf32, #tpu.memory_space<vmem>>, %arg4: memref<1x3x8x128xf32, #tpu.memory_space<vmem>>, %arg5: memref<3x8x128xf32, #tpu.memory_space<vmem>>) attributes {dimension_semantics = [#tpu.dimension_semantics<parallel>, #tpu.dimension_semantics<arbitrary>], iteration_bounds = array<i64: 1, 1>, scalar_prefetch = 0 : i64, scratch_operands = 1 : i64, tpu.core_type = #tpu.core_type<tc>, window_params = [{transform_indices = @transform_0, window_bounds = array<i64: 16, 128>}, {transform_indices = @transform_1, window_bounds = array<i64: 16, 128>}, {transform_indices = @transform_2, window_bounds = array<i64: 1, 3, 8, 128>}]} {
    %c0_i32 = arith.constant 0 : i32
    %0 = arith.cmpi eq, %arg1, %c0_i32 : i32
    %1 = arith.extui %0 : i1 to i32
    %c0_i32_0 = arith.constant 0 : i32
    %2 = arith.cmpi ne, %1, %c0_i32_0 : i32
    scf.if %2 {
      %cst_31 = arith.constant 0.000000e+00 : f32
      %58 = vector.broadcast %cst_31 : f32 to vector<3x8x128xf32>
      %c0_32 = arith.constant 0 : index
      %c0_33 = arith.constant 0 : index
      %c0_34 = arith.constant 0 : index
      %59 = vector.load %arg5[%c0_32, %c0_33, %c0_34] : memref<3x8x128xf32, #tpu.memory_space<vmem>>, vector<3x8x128xf32>
      tpu.vector_store %arg5[%c0_32, %c0_33, %c0_34], %58 {strides = array<i32>} : memref<3x8x128xf32, #tpu.memory_space<vmem>>, vector<3x8x128xf32>,
    } else {
    }
    %c0 = arith.constant 0 : index
    %c0_1 = arith.constant 0 : index
    %3 = vector.load %arg2[%c0, %c0_1] : memref<16x128xf32, #tpu.memory_space<vmem>>, vector<16x128xf32>
    %c0_2 = arith.constant 0 : index
    %c0_3 = arith.constant 0 : index
    %4 = vector.load %arg3[%c0_2, %c0_3] : memref<16x128xf32, #tpu.memory_space<vmem>>, vector<16x128xf32>
    %5 = math.absf %3 : vector<16x128xf32>
    %cst = arith.constant 0.000000e+00 : f32
    %6 = vector.broadcast %cst : f32 to vector<16x128xf32>
    %7 = arith.subf %6, %5 : vector<16x128xf32>
    %8 = math.exp %7 : vector<16x128xf32>
    %cst_4 = arith.constant 0.000000e+00 : f32
    %9 = vector.broadcast %cst_4 : f32 to vector<16x128xf32>
    %10 = arith.maximumf %3, %9 : vector<16x128xf32>
    %11 = arith.mulf %3, %4 : vector<16x128xf32>
    %12 = arith.subf %10, %11 : vector<16x128xf32>
    %13 = math.log1p %8 : vector<16x128xf32>
    %14 = arith.addf %12, %13 : vector<16x128xf32>
    %cst_5 = arith.constant 0.000000e+00 : f32
    %15 = vector.broadcast %cst_5 : f32 to vector<16x128xf32>
    %16 = arith.subf %15, %14 : vector<16x128xf32>
    %17 = math.exp %16 : vector<16x128xf32>
    %cst_6 = arith.constant 1.000000e+00 : f32
    %18 = vector.broadcast %cst_6 : f32 to vector<16x128xf32>
    %19 = arith.subf %18, %17 : vector<16x128xf32>
    %cst_7 = arith.constant 0.000000e+00 : f32
    %20 = vector.broadcast %cst_7 : f32 to vector<16x128xf32>
    %21 = arith.cmpf oge, %3, %20 : vector<16x128xf32>
    %cst_8 = arith.constant 1.000000e+00 : f32
    %22 = vector.broadcast %cst_8 : f32 to vector<16x128xf32>
    %23 = arith.select %21, %22, %8 : vector<16x128xi1>, vector<16x128xf32>
    %cst_9 = arith.constant 1.000000e+00 : f32
    %24 = vector.broadcast %cst_9 : f32 to vector<16x128xf32>
    %25 = arith.addf %24, %8 : vector<16x128xf32>
    %26 = arith.divf %23, %25 : vector<16x128xf32>
    %c0_10 = arith.constant 0 : index
    %c0_11 = arith.constant 0 : index
    %c0_12 = arith.constant 0 : index
    %27 = vector.load %arg5[%c0_10, %c0_11, %c0_12] : memref<3x8x128xf32, #tpu.memory_space<vmem>>, vector<1x8x128xf32>
    %28 = vector.shape_cast %27 : vector<1x8x128xf32> to vector<8x128xf32>
    %29 = arith.mulf %19, %19 : vector<16x128xf32>
    %30 = arith.mulf %29, %14 : vector<16x128xf32>
    %31 = vector.shape_cast %30 : vector<16x128xf32> to vector<2x8x128xf32>
    %cst_13 = arith.constant dense<0.000000e+00> : vector<8x128xf32>
    %32 = vector.multi_reduction <add>, %31, %cst_13 [0] : vector<2x8x128xf32> to vector<8x128xf32>
    %33 = arith.addf %28, %32 : vector<8x128xf32>
    %c0_14 = arith.constant 0 : index
    %c0_15 = arith.constant 0 : index
    %c0_16 = arith.constant 0 : index
    %34 = vector.load %arg5[%c0_14, %c0_15, %c0_16] : memref<3x8x128xf32, #tpu.memory_space<vmem>>, vector<1x8x128xf32>
    %35 = vector.shape_cast %34 : vector<1x8x128xf32> to vector<8x128xf32>
    %36 = vector.shape_cast %33 : vector<8x128xf32> to vector<1x8x128xf32>
    tpu.vector_store %arg5[%c0_14, %c0_15, %c0_16], %36 {strides = array<i32>} : memref<3x8x128xf32, #tpu.memory_space<vmem>>, vector<1x8x128xf32>,
    %c1 = arith.constant 1 : index
    %c0_17 = arith.constant 0 : index
    %c0_18 = arith.constant 0 : index
    %37 = vector.load %arg5[%c1, %c0_17, %c0_18] : memref<3x8x128xf32, #tpu.memory_space<vmem>>, vector<1x8x128xf32>
    %38 = vector.shape_cast %37 : vector<1x8x128xf32> to vector<8x128xf32>
    %39 = arith.mulf %26, %4 : vector<16x128xf32>
    %40 = vector.shape_cast %39 : vector<16x128xf32> to vector<2x8x128xf32>
    %cst_19 = arith.constant dense<0.000000e+00> : vector<8x128xf32>
    %41 = vector.multi_reduction <add>, %40, %cst_19 [0] : vector<2x8x128xf32> to vector<8x128xf32>
    %42 = arith.addf %38, %41 : vector<8x128xf32>
    %c1_20 = arith.constant 1 : index
    %c0_21 = arith.constant 0 : index
    %c0_22 = arith.constant 0 : index
    %43 = vector.load %arg5[%c1_20, %c0_21, %c0_22] : memref<3x8x128xf32, #tpu.memory_space<vmem>>, vector<1x8x128xf32>
    %44 = vector.shape_cast %43 : vector<1x8x128xf32> to vector<8x128xf32>
    %45 = vector.shape_cast %42 : vector<8x128xf32> to vector<1x8x128xf32>
    tpu.vector_store %arg5[%c1_20, %c0_21, %c0_22], %45 {strides = array<i32>} : memref<3x8x128xf32, #tpu.memory_space<vmem>>, vector<1x8x128xf32>,
    %c2 = arith.constant 2 : index
    %c0_23 = arith.constant 0 : index
    %c0_24 = arith.constant 0 : index
    %46 = vector.load %arg5[%c2, %c0_23, %c0_24] : memref<3x8x128xf32, #tpu.memory_space<vmem>>, vector<1x8x128xf32>
    %47 = vector.shape_cast %46 : vector<1x8x128xf32> to vector<8x128xf32>
    %48 = arith.addf %26, %4 : vector<16x128xf32>
    %49 = vector.shape_cast %48 : vector<16x128xf32> to vector<2x8x128xf32>
    %cst_25 = arith.constant dense<0.000000e+00> : vector<8x128xf32>
    %50 = vector.multi_reduction <add>, %49, %cst_25 [0] : vector<2x8x128xf32> to vector<8x128xf32>
    %51 = arith.addf %47, %50 : vector<8x128xf32>
    %c2_26 = arith.constant 2 : index
    %c0_27 = arith.constant 0 : index
    %c0_28 = arith.constant 0 : index
    %52 = vector.load %arg5[%c2_26, %c0_27, %c0_28] : memref<3x8x128xf32, #tpu.memory_space<vmem>>, vector<1x8x128xf32>
    %53 = vector.shape_cast %52 : vector<1x8x128xf32> to vector<8x128xf32>
    %54 = vector.shape_cast %51 : vector<8x128xf32> to vector<1x8x128xf32>
    tpu.vector_store %arg5[%c2_26, %c0_27, %c0_28], %54 {strides = array<i32>} : memref<3x8x128xf32, #tpu.memory_space<vmem>>, vector<1x8x128xf32>,
    %c0_i32_29 = arith.constant 0 : i32
    %55 = arith.cmpi eq, %arg1, %c0_i32_29 : i32
    %56 = arith.extui %55 : i1 to i32
    %c0_i32_30 = arith.constant 0 : i32
    %57 = arith.cmpi ne, %56, %c0_i32_30 : i32
    scf.if %57 {
      %c0_31 = arith.constant 0 : index
      %c0_32 = arith.constant 0 : index
      %c0_33 = arith.constant 0 : index
      %58 = vector.load %arg5[%c0_31, %c0_32, %c0_33] : memref<3x8x128xf32, #tpu.memory_space<vmem>>, vector<3x8x128xf32>
      %c0_34 = arith.constant 0 : index
      %c0_35 = arith.constant 0 : index
      %c0_36 = arith.constant 0 : index
      %c0_37 = arith.constant 0 : index
      %59 = vector.load %arg4[%c0_34, %c0_35, %c0_36, %c0_37] : memref<1x3x8x128xf32, #tpu.memory_space<vmem>>, vector<1x3x8x128xf32>
      %60 = vector.shape_cast %59 : vector<1x3x8x128xf32> to vector<3x8x128xf32>
      %61 = vector.shape_cast %58 : vector<3x8x128xf32> to vector<1x3x8x128xf32>
      tpu.vector_store %arg4[%c0_34, %c0_35, %c0_36, %c0_37], %61 {strides = array<i32>} : memref<1x3x8x128xf32, #tpu.memory_space<vmem>>, vector<1x3x8x128xf32>,
    } else {
    }
    return
  }
  func.func @transform_0(%arg0: i32, %arg1: i32) -> (i32, i32) {
    %c1_i32 = arith.constant 1 : i32
    %0 = arith.muli %arg0, %c1_i32 : i32
    %1 = arith.addi %0, %arg1 : i32
    %c0_i32 = arith.constant 0 : i32
    %c0_i32_0 = arith.constant 0 : i32
    return %1, %c0_i32 : i32, i32
  }
  func.func @transform_1(%arg0: i32, %arg1: i32) -> (i32, i32) {
    %c1_i32 = arith.constant 1 : i32
    %0 = arith.muli %arg0, %c1_i32 : i32
    %1 = arith.addi %0, %arg1 : i32
    %c0_i32 = arith.constant 0 : i32
    %c0_i32_0 = arith.constant 0 : i32
    return %1, %c0_i32 : i32, i32
  }
  func.func @transform_2(%arg0: i32, %arg1: i32) -> (i32, i32, i32, i32) {
    %c0_i32 = arith.constant 0 : i32
    %c0_i32_0 = arith.constant 0 : i32
    %c0_i32_1 = arith.constant 0 : i32
    %c0_i32_2 = arith.constant 0 : i32
    return %arg0, %c0_i32, %c0_i32_0, %c0_i32_1 : i32, i32, i32, i32
  }
}

</mosaic_0001>

<bundles_post_ra>
// kernel: tpu_custom_call.1
= control target key start
LH: loop header
LB: loop body
LE: loop exit
PB: predicated region body
PF: predicated region fallthrough
CT: control target
= control target key end

     0   :  { %7 = vsyncpa [#allocation4], 0  ;;  %s322_s0 = inlined_call_operand.hbm [shape: f32[16,128], index: 0, kind: input, shape index: {}]   ;;  %s323_s1 = inlined_call_operand.hbm [shape: f32[16,128], index: 1, kind: input, shape index: {}]   ;;  %s324_s2 = inlined_call_operand.hbm [shape: f32[1,3,8,128], index: 2, kind: output, shape index: {}]  }
   0x1   :  { %8 = vsyncpa [#allocation7], 0 }
   0x2   :  { %9 = vsyncpa [#allocation5], 0  ;;  %s257_s9 = smov [#allocation3]   ;;  %s185_s13 = scalar_lea.hbm %s322_s0, 256 }
   0x3   :  { %s19_s10 = sshll.u32 %s257_s9, 4  ;;  %p186_p0 = scmp.ne.s32.totalorder %s322_s0, %s185_s13  ;;  %s20_s10 = int_to_ptr.vmem [resolvable:$true] %s19_s10 }
   0x4   :  { %p189_p1 = scmp.lt.u32.totalorder %s185_s13, %s322_s0 }
   0x6   :  { %p191_p2 = pnand %p189_p1, %p186_p0 }
   0x8   :  { %194 = shalt.err (!%p191_p2)
}
   0x9   :  { %s195_s18 = scalar_lea.vmem %s20_s10, 256  ;;  %p200_p4 = scmp.lt.s32.totalorder %s20_s10, %s20_s10 }
   0xa   :  { %p196_p3 = scmp.ne.s32.totalorder %s20_s10, %s195_s18  ;;  %p201_p5 = scmp.lt.s32.totalorder %s195_s18, %s195_s18 }
   0xc   :  { %p202_p6 = por %p201_p5, %p200_p4 }
   0xe   :  { %p203_p7 = pnand %p202_p6, %p196_p3 }
  0x10   :  { %206 = shalt.err (!%p203_p7)
}
  0x11   :  { %s258_s19 = smov 128   ;;  %s259_s20 = smov 8  }
  0x12   :  { %25 = dma.hbm_to_vmem [thread:$0]  %s322_s0, 256, %s20_s10, [#allocation4], %s258_s19, %s258_s19, %s259_s20  }
  0x13   :  { %s260_s23 = smov [#allocation6]   ;;  %s207_s27 = scalar_lea.hbm %s323_s1, 256 }
  0x14   :  { %s35_s24 = sshll.u32 %s260_s23, 4  ;;  %p208_p8 = scmp.ne.s32.totalorder %s323_s1, %s207_s27  ;;  %s36_s24 = int_to_ptr.vmem [resolvable:$true] %s35_s24 }
  0x15   :  { %p211_p9 = scmp.lt.u32.totalorder %s207_s27, %s323_s1 }
  0x17   :  { %p213_p10 = pnand %p211_p9, %p208_p8 }
  0x19   :  { %216 = shalt.err (!%p213_p10)
}
  0x1a   :  { %s217_s4 = scalar_lea.vmem %s36_s24, 256  ;;  %p222_p12 = scmp.lt.s32.totalorder %s36_s24, %s36_s24 }
  0x1b   :  { %p218_p11 = scmp.ne.s32.totalorder %s36_s24, %s217_s4  ;;  %p223_p13 = scmp.lt.s32.totalorder %s217_s4, %s217_s4 }
  0x1d   :  { %p224_p0 = por %p223_p13, %p222_p12 }
  0x1f   :  { %p225_p1 = pnand %p224_p0, %p218_p11 }
  0x21   :  { %228 = shalt.err (!%p225_p1)
}
  0x22   :  { %41 = dma.hbm_to_vmem [thread:$0]  %s323_s1, 256, %s36_s24, [#allocation7], %s258_s19, %s258_s19, %s259_s20  }
  0x23   :  { %251 = dma.done.wait [#allocation4], 256  }
  0x24   :  { %252 = vsyncadd [#allocation4], 4294967040 }
  0x25   :  { %253 = dma.done.wait [#allocation7], 256  }
  0x26   :  { %254 = vsyncadd [#allocation7], 4294967040  ;;  %v59_v0 = vld [vmem:[#allocation3] sm:$0xff]  ;;  %v60_v1 = vld [vmem:[#allocation3 + $0x8] sm:$0xff]  ;;  %s261_s1 = smov [#allocation8]  }
  0x27   :  { %v63_v2 = vand.u32 2147483647, %v59_v0  ;;  %v64_v3 = vand.u32 2147483647, %v60_v1  ;;  %v61_v14 = vld [vmem:[#allocation6] sm:$0xff]  ;;  %v62_v15 = vld [vmem:[#allocation6 + $0x8] sm:$0xff] }
  0x28   :  { %v71_v17 = vmax.f32 %v59_v0, 0.0  ;;  %v73_v18 = vmul.f32 %v61_v14, %v59_v0  ;;  %v72_v21 = vmax.f32 %v60_v1, 0.0  ;;  %v74_v22 = vmul.f32 %v62_v15, %v60_v1  ;;  %s151_s6 = sshll.u32 %s261_s1, 4  ;;  %s152_s6 = int_to_ptr.vmem [resolvable:$true] %s151_s6 }
  0x29   :  { %v65_v4 = vsub.f32 0.0, %v63_v2  ;;  %v66_v5 = vsub.f32 0.0, %v64_v3  ;;  %vm105_vm0 = vcmp.ge.f32.partialorder %v59_v0, 0.0  ;;  %vm106_vm1 = vcmp.ge.f32.partialorder %v60_v1, 0.0  ;;  %s229_s7 = scalar_lea.vmem %s152_s6, 384  ;;  %p234_p3 = scmp.lt.s32.totalorder %s152_s6, %s152_s6 }
  0x2a   :  { %v75_v26 = vsub.f32 %v71_v17, %v73_v18  ;;  %v76_v30 = vsub.f32 %v72_v21, %v74_v22  ;;  %p230_p2 = scmp.ne.s32.totalorder %s152_s6, %s229_s7  ;;  %p235_p4 = scmp.lt.s32.totalorder %s229_s7, %s229_s7 }
  0x2b   :  { %v67_v6 = vmul.f32 1.442695, %v65_v4  ;;  %v69_v7 = vmul.f32 1.442695, %v66_v5 }
  0x2c   :  { %p236_p5 = por %p235_p4, %p234_p3 }
  0x2d   :  { %169 = vpow2.f32 %v67_v6 }
  0x2e   :  { %171 = vpow2.f32 %v69_v7  ;;  %p237_p6 = pnand %p236_p5, %p230_p2 }
  0x37   :  { %v170_v8 = vpop.eup %169 }
  0x38   :  { %v172_v9 = vpop.eup %171  ;;  %v77_v10 = vadd.f32 1.0, %v170_v8  ;;  %v80_v12 = vmul.f32 -0.5, %v170_v8  ;;  %v83_v19 = vand.u32 2147483647, %v170_v8  ;;  %v107_v28 = vsel %vm105_vm0, 1.0, %v170_v8 }
  0x39   :  { %v86_v11 = vadd.f32 1.0, %v172_v9  ;;  %v89_v13 = vmul.f32 -0.5, %v172_v9  ;;  %v92_v23 = vand.u32 2147483647, %v172_v9  ;;  %v108_v32 = vsel %vm106_vm1, 1.0, %v172_v9 }
  0x3a   :  { %173 = vlog2.f32 %v77_v10  ;;  %v81_v16 = vadd.f32 1.0, %v80_v12  ;;  %vm84_vm2 = vcmp.lt.f32.partialorder %v83_v19, 0.0004427343 }
  0x3b   :  { %175 = vlog2.f32 %v86_v11  ;;  %v90_v20 = vadd.f32 1.0, %v89_v13  ;;  %vm93_vm3 = vcmp.lt.f32.partialorder %v92_v23, 0.0004427343 }
  0x3c   :  { %177 = vrcp.f32 %v77_v10  ;;  %v82_v24 = vmul.f32 %v170_v8, %v81_v16 }
  0x3d   :  { %179 = vrcp.f32 %v86_v11  ;;  %v91_v27 = vmul.f32 %v172_v9, %v90_v20 }
  0x44   :  { %v174_v25 = vpop.eup %173 }
  0x45   :  { %v176_v29 = vpop.eup %175  ;;  %v79_v31 = vmul.f32 0.6931472, %v174_v25 }
  0x46   :  { %v178_v33 = vpop.eup %177  ;;  %v88_v34 = vmul.f32 0.6931472, %v176_v29 }
  0x47   :  { %v180_v35 = vpop.eup %179  ;;  %v85_v36 = vsel %vm84_vm2, %v82_v24, %v79_v31  ;;  %v112_v37 = vmul.f32 %v178_v33, %v107_v28 }
  0x48   :  { %v94_v38 = vsel %vm93_vm3, %v91_v27, %v88_v34  ;;  %v95_v39 = vadd.f32 %v85_v36, %v75_v26  ;;  %v114_v40 = vmul.f32 %v180_v35, %v108_v32 }
  0x49   :  { %v96_v41 = vadd.f32 %v94_v38, %v76_v30  ;;  %v125_v42 = vmul.f32 %v112_v37, %v61_v14  ;;  %v132_v43 = vadd.f32 %v112_v37, %v61_v14 }
  0x4a   :  { %v97_v44 = vsub.f32 0.0, %v95_v39  ;;  %v126_v45 = vmul.f32 %v114_v40, %v62_v15  ;;  %v133_v46 = vadd.f32 %v114_v40, %v62_v15 }
  0x4b   :  { %v98_v47 = vsub.f32 0.0, %v96_v41 }
  0x4c   :  { %v99_v48 = vmul.f32 1.442695, %v97_v44  ;;  %v127_v49 = vadd.f32 %v126_v45, %v125_v42  ;;  %v134_v50 = vadd.f32 %v133_v46, %v132_v43 }
  0x4d   :  { %v101_v51 = vmul.f32 1.442695, %v98_v47 }
  0x4e   :  { %181 = vpow2.f32 %v99_v48  ;;  %144 = vst [vmem:[#allocation8 + $0x8] sm:$0xff] %v127_v49  ;;  %145 = vst [vmem:[#allocation8 + $0x10] sm:$0xff] %v134_v50 }
  0x4f   :  { %183 = vpow2.f32 %v101_v51 }
  0x58   :  { %v182_v52 = vpop.eup %181 }
  0x59   :  { %v184_v53 = vpop.eup %183  ;;  %v103_v54 = vsub.f32 1.0, %v182_v52 }
  0x5a   :  { %v104_v55 = vsub.f32 1.0, %v184_v53 }
  0x5b   :  { %v116_v56 = vmul.f32 %v103_v54, %v103_v54 }
  0x5c   :  { %v117_v57 = vmul.f32 %v104_v55, %v104_v55 }
  0x5d   :  { %v118_v58 = vmul.f32 %v116_v56, %v95_v39 }
  0x5e   :  { %v119_v59 = vmul.f32 %v117_v57, %v96_v41 }
  0x60   :  { %v120_v60 = vadd.f32 %v119_v59, %v118_v58 }
  0x62   :  { %143 = vst [vmem:[#allocation8] sm:$0xff] %v120_v60 }
  0x63   :  { %240 = shalt.err (!%p237_p6)
}
  0x64   :  { %s241_s10 = scalar_lea.hbm %s324_s2, 384 }
  0x65   :  { %p242_p7 = scmp.ne.s32.totalorder %s324_s2, %s241_s10  ;;  %p245_p8 = scmp.lt.u32.totalorder %s241_s10, %s324_s2 }
  0x67   :  { %p247_p9 = pnand %p245_p8, %p242_p7 }
  0x69   :  { %250 = shalt.err (!%p247_p9)
}
  0x6a   :  { %157 = dma.vmem_to_hbm [thread:$0]  %s152_s6, 384, %s324_s2, [#allocation5], %s258_s19, %s258_s19, %s259_s20  }
  0x6b   :  { %255 = dma.done.wait [#allocation5], 384  }
  0x6c   :  { %256 = vsyncadd [#allocation5], 4294966912 }
  0x6d   :  { %161 = vsyncpa [#allocation4], 1 }
  0x6e   :  { %162 = vsyncpa [#allocation7], 1 }
  0x6f   :  { %163 = vsyncpa [#allocation5], 1 }

</bundles_post_ra>
